<compile_context>
chip_gen: v5e
topology: v5e:2x2
jax: 0.10.0
libtpu: 0.0.40
codegen_flags: <defaults>
</compile_context>

<pallas_src>
import math

import jax
import jax.numpy as jnp
from jax.experimental import pallas as pl
from jax.experimental.pallas import tpu as pltpu


def make_positional_encoding(d_model: int, max_len: int = 5000) -> jnp.ndarray:
    """Deterministic sinusoidal table, identical to the PyTorch __init__ (f32)."""
    position = jnp.arange(0, max_len, dtype=jnp.float32)[:, None]            # (max_len, 1)
    div_term = jnp.exp(
        jnp.arange(0, d_model, 2, dtype=jnp.float32) * (-math.log(10000.0) / d_model)
    )                                                                        # (ceil(d/2),)
    pe = jnp.zeros((max_len, d_model), dtype=jnp.float32)
    pe = pe.at[:, 0::2].set(jnp.sin(position * div_term))
    pe = pe.at[:, 1::2].set(jnp.cos(position * div_term)[:, : d_model // 2])
    return pe                                                                # (max_len, d_model)


def _pe_add_kernel(x_ref, pe_ref, o_ref):
    # x_ref / o_ref: (TB, TC) tile of the flattened (batch, seq*d_model) input / output.
    # pe_ref:        (1, TC) tile of the flattened positional table; the VPU
    #                sublane-broadcasts it over the TB batch rows (cheap, fully
    #                hidden under DMA for this HBM-bound kernel).
    o_ref[...] = x_ref[...] + pe_ref[...]


def _cdiv(a: int, b: int) -> int:
    return -(-a // b)


def _sublane(dtype) -> int:
    # Native sublane packing: 8 rows for 32-bit, 16 for 16-bit, 32 for 8-bit dtypes.
    return max(8, 32 // jnp.dtype(dtype).itemsize)


def _choose_tiles(batch: int, cols: int, dtype, target_block_bytes: int = 4 << 20):
    """Pick (row_tile, padded_rows, col_tile) using sublane-PADDED VMEM sizes.

    A (row_tile, col_tile) block always occupies at least one full sublane tile of
    rows in VMEM (8 f32 / 16 bf16 / 32 int8), so the budget is computed against the
    padded row count, not the nominal one.  Column tiles are multiples of 128 (or
    the full width) and prefer exact divisors of `cols` to avoid a ragged tail.
    """
    itemsize = jnp.dtype(dtype).itemsize
    sub = _sublane(dtype)

    # Row tile: full batch if it fits one native sublane tile, else exactly one
    # sublane tile so vregs / VMEM blocks stay densely packed (perf review #1, #5).
    row_tile = batch if batch <= sub else sub
    padded_rows = sub

    # Column tile sized off the PADDED footprint of an x block (lane-aligned).
    max_tc = max(128, (target_block_bytes // (padded_rows * itemsize)) // 128 * 128)

    if cols <= max_tc:
        col_tile = cols                      # full width (always layout-legal)
        # Spend leftover budget on more batch rows per block (fewer ~0.35 us steps).
        if batch > row_tile:
            rows_budget = max(sub, (target_block_bytes // (col_tile * itemsize)) // sub * sub)
            row_tile = max(row_tile, min(batch, rows_budget))
            padded_rows = _cdiv(row_tile, sub) * sub
    else:
        # Prefer a column tile that divides cols exactly (no ragged tail -> fully
        # dense, unmasked stores), searching down from max_tc, never below max_tc//2.
        col_tile = max_tc
        t = max_tc
        floor = max(128, max_tc // 2)
        while t >= floor:
            if cols % t == 0:
                col_tile = t
                break
            t -= 128

    # v7x has 2 TensorCores: make sure a non-trivial problem exposes >= 2 grid steps
    # along a "parallel" axis so both cores get work.  No effect on 1-TC v5e/v6e
    # beyond one extra tiny grid step.
    n_steps = _cdiv(cols, col_tile) * _cdiv(batch, row_tile)
    if n_steps < 2 and batch * cols * itemsize > (4 << 20):
        if cols >= 256:
            col_tile = _cdiv(_cdiv(cols, 2), 128) * 128      # multiple of 128 -> legal
        elif batch >= 2 * sub:
            row_tile = _cdiv(batch // 2, sub) * sub
            padded_rows = row_tile

    return row_tile, padded_rows, col_tile


# Lazily resolved: does this JAX build accept pipeline_mode=pl.Buffered(1)?
_SINGLE_BUFFER_PE_OK = hasattr(pl, "Buffered")


def positional_encoding_forward(x: jnp.ndarray, pe_table: jnp.ndarray,
                                *, col_tile=None) -> jnp.ndarray:
    """x: [batch, seq_len, d_model] -> x + pe[:seq_len] (broadcast over batch).

    `pe_table` may be the raw (max_len, d_model) table or a pre-flattened
    (1, max_len*d_model) table (preferred: see PositionalEncoding, which also
    caches the dtype cast so no per-call copy of the table is made).
    """
    B, S, D = x.shape
    if pe_table.ndim != 2:
        raise ValueError("pe_table must be 2-D")
    if pe_table.shape[0] == 1:
        pe_flat = pe_table
    else:
        if pe_table.shape[1] != D:
            raise ValueError(f"d_model mismatch: x has {D}, pe table has {pe_table.shape[1]}")
        pe_flat = pe_table.reshape(1, -1)

    cols = S * D
    if cols > pe_flat.shape[1]:
        raise ValueError(f"seq_len={S} exceeds positional table max_len")
    if pe_flat.dtype != x.dtype:
        # One-off per-call cast; prefer the PositionalEncoding class, which caches it.
        pe_flat = pe_flat.astype(x.dtype)

    # Lane-dense layout: flatten (seq, d_model) so the lane dim is wide even when
    # d_model < 128.  Flattened PE column s*D + d lines up with x's column exactly,
    # so the full table can be indexed directly as long as the column tile is a
    # multiple of 128; otherwise take a cheap (no-cast) prefix slice.
    x2d = x.reshape(B, cols)
    pe_in = pe_flat if (cols % 128 == 0 or pe_flat.shape[1] == cols) else pe_flat[:, :cols]

    tb, padded_rows, tc = _choose_tiles(B, cols, x.dtype)
    if col_tile is not None and col_tile % 128 == 0 and col_tile < cols:
        tc = col_tile                                 # explicit override (multiple of 128)

    # Sublane-PADDED VMEM footprint: x & out double-buffered; the (1, tc) PE block
    # pads to a full sublane tile and is counted at 2 buffers even though we request
    # single-buffering (conservative if pipeline_mode is unsupported / ignored).
    itemsize = jnp.dtype(x.dtype).itemsize
    sub = _sublane(x.dtype)
    x_blk = padded_rows * tc * itemsize
    pe_blk = sub * tc * itemsize
    footprint = 4 * x_blk + 2 * pe_blk
    # Explicit scoped-VMEM limit: above the 16 MiB v5e default, <= 48 MiB so v7x's
    # 64 MiB physical VMEM keeps headroom (v5e/v6e have 128 MiB physical).
    vmem_limit = int(min(48 << 20, max(32 << 20, footprint + (4 << 20))))

    grid = (_cdiv(cols, tc), _cdiv(B, tb))            # (column tiles OUTER, row tiles INNER)

    def _call(single_buffer_pe: bool):
        pe_kwargs = {}
        if single_buffer_pe:
            # PE only changes on the outer column axis and is reused across every
            # inner batch step -> one buffer suffices; halves its padded VMEM cost.
            pe_kwargs["pipeline_mode"] = pl.Buffered(1)
        return pl.pallas_call(
            _pe_add_kernel,
            out_shape=jax.ShapeDtypeStruct((B, cols), x.dtype),
            grid_spec=pltpu.PrefetchScalarGridSpec(
                num_scalar_prefetch=0,
                grid=grid,
                in_specs=[
                    pl.BlockSpec((tb, tc), lambda c, r: (r, c)),
                    # PE block index ignores the (inner) row axis -> fetched once per
                    # column tile and reused across the batch rows.
                    pl.BlockSpec((1, tc), lambda c, r: (0, c), **pe_kwargs),
                ],
                out_specs=pl.BlockSpec((tb, tc), lambda c, r: (r, c)),
            ),
            compiler_params=pltpu.CompilerParams(
                # Elementwise: both axes independent -> megacore sharding on v7x.
                dimension_semantics=("parallel", "parallel"),
                vmem_limit_bytes=vmem_limit,
            ),
        )(x2d, pe_in)

    global _SINGLE_BUFFER_PE_OK
    if _SINGLE_BUFFER_PE_OK:
        try:
            out2d = _call(True)
        except Exception:
            # Some JAX builds reject pipeline_mode=pl.Buffered(1); buffering depth is
            # semantically transparent, so fall back to the default double-buffered PE.
            _SINGLE_BUFFER_PE_OK = False
            out2d = _call(False)
    else:
        out2d = _call(False)

    return out2d.reshape(B, S, D)


class PositionalEncoding:
    """JAX/Pallas mirror of the PyTorch module: builds the sinusoidal table once
    (cast to the working dtype and flattened lane-dense) and adds it per forward."""

    def __init__(self, d_model: int, max_len: int = 5000, dtype=jnp.float32):
        self.d_model = d_model
        self.max_len = max_len
        pe = make_positional_encoding(d_model, max_len)
        # Cache the dtype-cast, flattened table ONCE (avoids a per-call astype that
        # would re-materialize the whole table in HBM on every forward).
        self.pe_flat = pe.astype(dtype).reshape(1, max_len * d_model)

    def __call__(self, x: jnp.ndarray, *, col_tile=None) -> jnp.ndarray:
        return positional_encoding_forward(x, self.pe_flat, col_tile=col_tile)


if __name__ == "__main__":
    max_len = 5000

    # Test 1: module-style usage (batch-first), small shape, single-block fast path.
    batch, seq_len, d_model = 2, 8, 32                # cols = 256
    key = jax.random.PRNGKey(0)
    x = jax.random.normal(key, (batch, seq_len, d_model), dtype=jnp.float32)
    module = PositionalEncoding(d_model, max_len, dtype=jnp.float32)
    out = jax.block_until_ready(module(x))
    pe_full = make_positional_encoding(d_model, max_len)
    ref = x + pe_full[None, :seq_len, :]
    assert out.shape == (batch, seq_len, d_model)
    assert jnp.allclose(out, ref, atol=1e-6), "mismatch vs reference (single-block path)"

    # Test 2: forced multi-tile grid (exercises column tiling, PE tile reuse, and
    # direct indexing into the cached full table).
    b2, s2, d2 = 4, 16, 32                            # cols = 512 -> 4 column tiles of 128
    x2 = jax.random.normal(jax.random.PRNGKey(1), (b2, s2, d2), dtype=jnp.float32)
    out2 = jax.block_until_ready(module(x2, col_tile=128))
    ref2 = x2 + pe_full[None, :s2, :]
    assert jnp.allclose(out2, ref2, atol=1e-6), "mismatch vs reference (tiled path)"

    # Test 3: bf16 input with batch larger than one f32 sublane tile (exercises the
    # dtype-aware row tiling and the cached bf16 table).
    b3, s3, d3 = 20, 8, 32
    mod_bf16 = PositionalEncoding(d3, max_len, dtype=jnp.bfloat16)
    x3 = jax.random.normal(jax.random.PRNGKey(2), (b3, s3, d3), dtype=jnp.bfloat16)
    out3 = jax.block_until_ready(mod_bf16(x3))
    ref3 = x3 + pe_full[None, :s3, :].astype(jnp.bfloat16)
    assert jnp.allclose(out3.astype(jnp.float32), ref3.astype(jnp.float32), atol=1e-2), \
        "mismatch vs reference (bf16 path)"

    print("KERNEL_OK")
</pallas_src>

<mosaic_0001>
module attributes {stable_mosaic.version = 11 : i64} {
  func.func @_pe_add_kernel(%arg0: i32, %arg1: i32, %arg2: memref<2x256xf32, #tpu.memory_space<vmem>>, %arg3: memref<1x256xf32, #tpu.memory_space<vmem>>, %arg4: memref<2x256xf32, #tpu.memory_space<vmem>>) attributes {dimension_semantics = [#tpu.dimension_semantics<parallel>, #tpu.dimension_semantics<parallel>], iteration_bounds = array<i64: 1, 1>, scalar_prefetch = 0 : i64, scratch_operands = 0 : i64, tpu.core_type = #tpu.core_type<tc>, window_params = [{transform_indices = @transform_0, window_bounds = array<i64: 2, 256>}, {pipeline_mode = #tpu.pipeline_mode<synchronous>, transform_indices = @transform_1, window_bounds = array<i64: 1, 256>}, {transform_indices = @transform_2, window_bounds = array<i64: 2, 256>}]} {
    %c0 = arith.constant 0 : index
    %c0_0 = arith.constant 0 : index
    %0 = vector.load %arg2[%c0, %c0_0] : memref<2x256xf32, #tpu.memory_space<vmem>>, vector<2x256xf32>
    %c0_1 = arith.constant 0 : index
    %c0_2 = arith.constant 0 : index
    %1 = vector.load %arg3[%c0_1, %c0_2] : memref<1x256xf32, #tpu.memory_space<vmem>>, vector<1x256xf32>
    %2 = vector.broadcast %1 : vector<1x256xf32> to vector<2x256xf32>
    %3 = arith.addf %0, %2 : vector<2x256xf32>
    %c0_3 = arith.constant 0 : index
    %c0_4 = arith.constant 0 : index
    %4 = vector.load %arg4[%c0_3, %c0_4] : memref<2x256xf32, #tpu.memory_space<vmem>>, vector<2x256xf32>
    tpu.vector_store %arg4[%c0_3, %c0_4], %3 {strides = array<i32>} : memref<2x256xf32, #tpu.memory_space<vmem>>, vector<2x256xf32>,
    return
  }
  func.func @transform_0(%arg0: i32, %arg1: i32) -> (i32, i32) {
    %c0_i32 = arith.constant 0 : i32
    return %arg1, %arg0 : i32, i32
  }
  func.func @transform_1(%arg0: i32, %arg1: i32) -> (i32, i32) {
    %c0_i32 = arith.constant 0 : i32
    %c0_i32_0 = arith.constant 0 : i32
    return %c0_i32, %arg0 : i32, i32
  }
  func.func @transform_2(%arg0: i32, %arg1: i32) -> (i32, i32) {
    %c0_i32 = arith.constant 0 : i32
    return %arg1, %arg0 : i32, i32
  }
}

module attributes {stable_mosaic.version = 11 : i64} {
  func.func @_pe_add_kernel(%arg0: i32, %arg1: i32, %arg2: memref<2x256xf32, #tpu.memory_space<vmem>>, %arg3: memref<1x256xf32, #tpu.memory_space<vmem>>, %arg4: memref<2x256xf32, #tpu.memory_space<vmem>>) attributes {dimension_semantics = [#tpu.dimension_semantics<parallel>, #tpu.dimension_semantics<parallel>], iteration_bounds = array<i64: 1, 1>, scalar_prefetch = 0 : i64, scratch_operands = 0 : i64, tpu.core_type = #tpu.core_type<tc>, window_params = [{transform_indices = @transform_0, window_bounds = array<i64: 2, 256>}, {transform_indices = @transform_1, window_bounds = array<i64: 1, 256>}, {transform_indices = @transform_2, window_bounds = array<i64: 2, 256>}]} {
    %c0 = arith.constant 0 : index
    %c0_0 = arith.constant 0 : index
    %0 = vector.load %arg2[%c0, %c0_0] : memref<2x256xf32, #tpu.memory_space<vmem>>, vector<2x256xf32>
    %c0_1 = arith.constant 0 : index
    %c0_2 = arith.constant 0 : index
    %1 = vector.load %arg3[%c0_1, %c0_2] : memref<1x256xf32, #tpu.memory_space<vmem>>, vector<1x256xf32>
    %2 = vector.broadcast %1 : vector<1x256xf32> to vector<2x256xf32>
    %3 = arith.addf %0, %2 : vector<2x256xf32>
    %c0_3 = arith.constant 0 : index
    %c0_4 = arith.constant 0 : index
    %4 = vector.load %arg4[%c0_3, %c0_4] : memref<2x256xf32, #tpu.memory_space<vmem>>, vector<2x256xf32>
    tpu.vector_store %arg4[%c0_3, %c0_4], %3 {strides = array<i32>} : memref<2x256xf32, #tpu.memory_space<vmem>>, vector<2x256xf32>,
    return
  }
  func.func @transform_0(%arg0: i32, %arg1: i32) -> (i32, i32) {
    %c0_i32 = arith.constant 0 : i32
    return %arg1, %arg0 : i32, i32
  }
  func.func @transform_1(%arg0: i32, %arg1: i32) -> (i32, i32) {
    %c0_i32 = arith.constant 0 : i32
    %c0_i32_0 = arith.constant 0 : i32
    return %c0_i32, %arg0 : i32, i32
  }
  func.func @transform_2(%arg0: i32, %arg1: i32) -> (i32, i32) {
    %c0_i32 = arith.constant 0 : i32
    return %arg1, %arg0 : i32, i32
  }
}

</mosaic_0001>

<bundles_post_ra>
// kernel: tpu_custom_call.1
= control target key start
LH: loop header
LB: loop body
LE: loop exit
PB: predicated region body
PF: predicated region fallthrough
CT: control target
= control target key end

     0   :  { %7 = vsyncpa [#allocation3], 0  ;;  %s177_s0 = inlined_call_operand.hbm [shape: f32[2,256], index: 0, kind: input, shape index: {}]   ;;  %s178_s1 = inlined_call_operand.hbm [shape: f32[1,160000], index: 1, kind: input, shape index: {}]   ;;  %s179_s2 = inlined_call_operand.hbm [shape: f32[2,256], index: 2, kind: output, shape index: {}]  }
   0x1   :  { %8 = vsyncpa [#allocation6], 0 }
   0x2   :  { %9 = vsyncpa [#allocation4], 0  ;;  %s15_s11 = sshll.u32 %s177_s0, 4  ;;  %s150_s12 = smov [#allocation2]   ;;  %s16_s11 = int_to_ptr.hbm [resolvable:$true] %s15_s11 }
   0x3   :  { %s17_s13 = sshll.u32 %s150_s12, 4  ;;  %s26_s16 = sshll.u32 %s178_s1, 4  ;;  %s18_s13 = int_to_ptr.vmem [resolvable:$true] %s17_s13  ;;  %s27_s16 = int_to_ptr.hbm [resolvable:$true] %s26_s16 }
   0x4   :  { %20 = dma.hbm_to_vmem [thread:$0]  %s16_s11, 64, %s18_s13, [#allocation3]  }
   0x5   :  { %s151_s17 = smov [#allocation5]  }
   0x6   :  { %s28_s18 = sshll.u32 %s151_s17, 4  ;;  %s29_s18 = int_to_ptr.vmem [resolvable:$true] %s28_s18 }
   0x7   :  { %31 = dma.hbm_to_vmem [thread:$0]  %s27_s16, 32, %s29_s18, [#allocation6]  }
   0x8   :  { %144 = dma.done.wait [#allocation3], 64  }
   0x9   :  { %145 = vsyncadd [#allocation3], 4294967232 }
   0xa   :  { %146 = dma.done.wait [#allocation6], 32  }
   0xb   :  { %147 = vsyncadd [#allocation6], 4294967264  ;;  %v41_v0 = vld [vmem:[#allocation5] sm:$0x3]  ;;  %vm46_vm0 = vcmask 1041408   ;;  %s152_s0 = smov [#allocation7]  }
   0xc   :  { %v43_v1 = vperm.slane %v41_v0, 0  ;;  %v44_v2 = vperm.slane %v41_v0, 1  ;;  %v40_v3 = vld [vmem:[#allocation2] sm:$0xf]  ;;  %s56_s19 = sshll.u32 %s152_s0, 4  ;;  %s58_s21 = sshll.u32 %s179_s2, 4  ;;  %s57_s19 = int_to_ptr.vmem [resolvable:$true] %s56_s19  ;;  %s59_s21 = int_to_ptr.hbm [resolvable:$true] %s58_s21 }
   0xe   :  { %v45_v4 = vrot.slane %v44_v2, 6 }
  0x10   :  { %v47_v5 = vsel %vm46_vm0, %v43_v1, %v45_v4 }
  0x11   :  { %v49_v6 = vadd.f32 %v47_v5, %v40_v3 }
  0x13   :  { %50 = vst [vmem:[#allocation7] sm:$0xf] %v49_v6 }
  0x14   :  { %61 = dma.vmem_to_hbm [thread:$0]  %s57_s19, 64, %s59_s21, [#allocation4]  }
  0x15   :  { %148 = dma.done.wait [#allocation4], 64  }
  0x16   :  { %149 = vsyncadd [#allocation4], 4294967232 }
  0x17   :  { %66 = vsyncpa [#allocation3], 1 }
  0x18   :  { %67 = vsyncpa [#allocation6], 1 }
  0x19   :  { %68 = vsyncpa [#allocation4], 1 }

// kernel: tpu_custom_call.1
= control target key start
LH: loop header
LB: loop body
LE: loop exit
PB: predicated region body
PF: predicated region fallthrough
CT: control target
= control target key end

     0   :  { %7 = vsyncpa [#allocation3], 0  ;;  %s177_s0 = inlined_call_operand.hbm [shape: f32[2,256], index: 0, kind: input, shape index: {}]   ;;  %s178_s1 = inlined_call_operand.hbm [shape: f32[1,160000], index: 1, kind: input, shape index: {}]   ;;  %s179_s2 = inlined_call_operand.hbm [shape: f32[2,256], index: 2, kind: output, shape index: {}]  }
   0x1   :  { %8 = vsyncpa [#allocation6], 0 }
   0x2   :  { %9 = vsyncpa [#allocation4], 0  ;;  %s15_s11 = sshll.u32 %s177_s0, 4  ;;  %s150_s12 = smov [#allocation2]   ;;  %s16_s11 = int_to_ptr.hbm [resolvable:$true] %s15_s11 }
   0x3   :  { %s17_s13 = sshll.u32 %s150_s12, 4  ;;  %s26_s16 = sshll.u32 %s178_s1, 4  ;;  %s18_s13 = int_to_ptr.vmem [resolvable:$true] %s17_s13  ;;  %s27_s16 = int_to_ptr.hbm [resolvable:$true] %s26_s16 }
   0x4   :  { %20 = dma.hbm_to_vmem [thread:$0]  %s16_s11, 64, %s18_s13, [#allocation3]  }
   0x5   :  { %s151_s17 = smov [#allocation5]  }
   0x6   :  { %s28_s18 = sshll.u32 %s151_s17, 4  ;;  %s29_s18 = int_to_ptr.vmem [resolvable:$true] %s28_s18 }
   0x7   :  { %31 = dma.hbm_to_vmem [thread:$0]  %s27_s16, 32, %s29_s18, [#allocation6]  }
   0x8   :  { %144 = dma.done.wait [#allocation3], 64  }
   0x9   :  { %145 = vsyncadd [#allocation3], 4294967232 }
   0xa   :  { %146 = dma.done.wait [#allocation6], 32  }
   0xb   :  { %147 = vsyncadd [#allocation6], 4294967264  ;;  %v41_v0 = vld [vmem:[#allocation5] sm:$0x3]  ;;  %vm46_vm0 = vcmask 1041408   ;;  %s152_s0 = smov [#allocation7]  }
   0xc   :  { %v43_v1 = vperm.slane %v41_v0, 0  ;;  %v44_v2 = vperm.slane %v41_v0, 1  ;;  %v40_v3 = vld [vmem:[#allocation2] sm:$0xf]  ;;  %s56_s19 = sshll.u32 %s152_s0, 4  ;;  %s58_s21 = sshll.u32 %s179_s2, 4  ;;  %s57_s19 = int_to_ptr.vmem [resolvable:$true] %s56_s19  ;;  %s59_s21 = int_to_ptr.hbm [resolvable:$true] %s58_s21 }
   0xe   :  { %v45_v4 = vrot.slane %v44_v2, 6 }
  0x10   :  { %v47_v5 = vsel %vm46_vm0, %v43_v1, %v45_v4 }
  0x11   :  { %v49_v6 = vadd.f32 %v47_v5, %v40_v3 }
  0x13   :  { %50 = vst [vmem:[#allocation7] sm:$0xf] %v49_v6 }
  0x14   :  { %61 = dma.vmem_to_hbm [thread:$0]  %s57_s19, 64, %s59_s21, [#allocation4]  }
  0x15   :  { %148 = dma.done.wait [#allocation4], 64  }
  0x16   :  { %149 = vsyncadd [#allocation4], 4294967232 }
  0x17   :  { %66 = vsyncpa [#allocation3], 1 }
  0x18   :  { %67 = vsyncpa [#allocation6], 1 }
  0x19   :  { %68 = vsyncpa [#allocation4], 1 }

</bundles_post_ra>
